<compile_context>
chip_gen: v7x
topology: tpu7x:2x2x1
jax: 0.10.0
libtpu: 0.0.40
codegen_flags: <defaults>
</compile_context>

<pallas_src>
import math
import jax
import jax.numpy as jnp
from jax.experimental import pallas as pl
from jax.experimental.pallas import tpu as pltpu


_VMEM_LIMIT = 32 * 1024 * 1024   # bf16 + single-buffered W_hh fits well under this


# --------------------------- tiled linear kernel ---------------------------
# Hoisted per-layer input projection over all T steps, N-tiled so the weight
# column blocks pipeline under the matmul (and shard across v7x megacore).

def _linear_kernel(x_ref, w_ref, b_ref, o_ref):
    o_ref[...] = (jnp.dot(x_ref[...].astype(jnp.bfloat16), w_ref[...],
                          preferred_element_type=jnp.float32)
                  + b_ref[...])


def linear_pallas(x, w_t_bf16, b, *, tn=512):
    """x: (M, K) f32, w_t_bf16: (K, N) bf16, b: (N,) f32 -> (M, N) f32."""
    M, K = x.shape
    N = w_t_bf16.shape[1]
    tn = min(tn, N)
    return pl.pallas_call(
        _linear_kernel,
        out_shape=jax.ShapeDtypeStruct((M, N), jnp.float32),
        grid=(pl.cdiv(N, tn),),
        in_specs=[pl.BlockSpec((M, K), lambda j: (0, 0)),
                  pl.BlockSpec((K, tn), lambda j: (0, j)),
                  pl.BlockSpec((1, tn), lambda j: (0, j))],
        out_specs=pl.BlockSpec((M, tn), lambda j: (0, j)),
        compiler_params=pltpu.CompilerParams(
            dimension_semantics=("parallel",),
            vmem_limit_bytes=_VMEM_LIMIT),
    )(x, w_t_bf16, b.reshape(1, N))


# --------------------------- LSTM recurrence kernel ---------------------------
# One invocation per layer: W_hh (bf16) DMA'd once into a single VMEM scratch
# buffer, static in-kernel time loop, fused 4-gate matmul per step.

def _lstm_recurrent_kernel(xproj_ref, whh_hbm, h0_ref, c0_ref,
                           y_ref, hT_ref, cT_ref,
                           whh_vmem, dma_sem):
    T = xproj_ref.shape[0]
    H = h0_ref.shape[-1]

    # Single-buffered resident copy of W_hh: HBM -> VMEM exactly once.
    cp = pltpu.make_async_copy(whh_hbm, whh_vmem, dma_sem)
    cp.start()
    cp.wait()

    w_hh = whh_vmem[...]          # (H, 4H) bf16, VMEM-resident for all T steps
    h = h0_ref[...]               # (B, H) f32
    c = c0_ref[...]               # (B, H) f32

    for t in range(T):            # static trip count (T=8) -> fully unrolled
        pre = xproj_ref[t] + jnp.dot(h.astype(jnp.bfloat16), w_hh,
                                     preferred_element_type=jnp.float32)
        # PyTorch gate order along columns: [i | f | g | o]
        i_g = jax.nn.sigmoid(pre[:, 0:H])
        f_g = jax.nn.sigmoid(pre[:, H:2 * H])
        g_g = jnp.tanh(pre[:, 2 * H:3 * H])
        o_g = jax.nn.sigmoid(pre[:, 3 * H:4 * H])
        c = f_g * c + i_g * g_g
        h = o_g * jnp.tanh(c)
        y_ref[t] = h

    hT_ref[...] = h
    cT_ref[...] = c


def lstm_layer_pallas(xproj_tb4h, w_hh_t_bf16, h0, c0):
    """One LSTM layer over the full sequence.

    xproj_tb4h:   (T, B, 4H) f32   precomputed X @ W_ih^T + b_ih + b_hh
    w_hh_t_bf16:  (H, 4H)    bf16  gate order [i|f|g|o] along columns
    h0, c0:       (B, H)     f32
    returns       y: (T, B, H), h_T: (B, H), c_T: (B, H)
    """
    T, B, fourH = xproj_tb4h.shape
    H = h0.shape[-1]
    assert fourH == 4 * H

    return pl.pallas_call(
        _lstm_recurrent_kernel,
        out_shape=(jax.ShapeDtypeStruct((T, B, H), jnp.float32),
                   jax.ShapeDtypeStruct((B, H), jnp.float32),
                   jax.ShapeDtypeStruct((B, H), jnp.float32)),
        grid=(1,),
        in_specs=[
            pl.BlockSpec((T, B, 4 * H), lambda i: (0, 0, 0)),   # x_proj (all T)
            pl.BlockSpec(memory_space=pl.ANY),                  # W_hh in HBM
            pl.BlockSpec((B, H),        lambda i: (0, 0)),      # h0
            pl.BlockSpec((B, H),        lambda i: (0, 0)),      # c0
        ],
        out_specs=[
            pl.BlockSpec((T, B, H), lambda i: (0, 0, 0)),       # y
            pl.BlockSpec((B, H),    lambda i: (0, 0)),          # h_T
            pl.BlockSpec((B, H),    lambda i: (0, 0)),          # c_T
        ],
        scratch_shapes=[
            pltpu.VMEM((H, 4 * H), jnp.bfloat16),               # resident W_hh
            pltpu.SemaphoreType.DMA(()),
        ],
        compiler_params=pltpu.CompilerParams(
            dimension_semantics=("arbitrary",),
            vmem_limit_bytes=_VMEM_LIMIT),
    )(xproj_tb4h, w_hh_t_bf16, h0, c0)


# ------------------------------ parameter setup ------------------------------

def init_params(key, input_size, hidden_size, output_size, num_layers):
    bound = 1.0 / math.sqrt(hidden_size)
    params = {"lstm": []}
    for layer in range(num_layers):
        in_l = input_size if layer == 0 else hidden_size
        key, k1, k2, k3, k4 = jax.random.split(key, 5)
        w_ih = jax.random.uniform(k1, (4 * hidden_size, in_l), jnp.float32, -bound, bound)
        w_hh = jax.random.uniform(k2, (4 * hidden_size, hidden_size), jnp.float32, -bound, bound)
        b_ih = jax.random.uniform(k3, (4 * hidden_size,), jnp.float32, -bound, bound)
        b_hh = jax.random.uniform(k4, (4 * hidden_size,), jnp.float32, -bound, bound)
        params["lstm"].append((w_ih, w_hh, b_ih, b_hh))
    key, k1, k2 = jax.random.split(key, 3)
    params["cls_w"] = jax.random.uniform(k1, (output_size, hidden_size), jnp.float32, -bound, bound)
    params["cls_b"] = jax.random.uniform(k2, (output_size,), jnp.float32, -bound, bound)
    return params


# ------------------------------ forward (Pallas) ------------------------------

def _pad_axis(a, axis, target):
    pad = target - a.shape[axis]
    if pad == 0:
        return a
    widths = [(0, 0)] * a.ndim
    widths[axis] = (0, pad)
    return jnp.pad(a, widths)


def my_lstm_forward(x, h0, c0, params, hidden_size):
    """Equivalent of MyLSTM.forward.  x: (B, T, input_size) [batch_first],
    h0/c0: (num_layers, B, H).  Returns (result, (h, c))."""
    num_layers = h0.shape[0]
    H = hidden_size
    B = x.shape[0]

    # Pad batch to a full sublane group (8) so all stores are unmasked.
    B_pad = ((B + 7) // 8) * 8
    x_p = _pad_axis(x, 0, B_pad)
    h0_p = _pad_axis(h0, 1, B_pad)
    c0_p = _pad_axis(c0, 1, B_pad)

    layer_in = jnp.transpose(x_p, (1, 0, 2))      # -> time-major (T, B_pad, in)
    T = layer_in.shape[0]
    h_outs, c_outs = [], []
    for layer in range(num_layers):
        w_ih, w_hh, b_ih, b_hh = params["lstm"][layer]
        in_dim = w_ih.shape[1]
        # bf16 weight streaming (f32 accumulation on the MXU).
        w_ih_t = jnp.transpose(w_ih).astype(jnp.bfloat16)   # (in, 4H), cols [i|f|g|o]
        w_hh_t = jnp.transpose(w_hh).astype(jnp.bfloat16)   # (H, 4H)
        bias = b_ih + b_hh                                   # (4H,) f32, folded into proj

        # Hoisted input projection for all T steps at once (M = T*B_pad rows),
        # N-tiled so weight-column DMA pipelines / shards across cores.
        xproj = linear_pallas(layer_in.reshape(T * B_pad, in_dim), w_ih_t, bias)
        xproj = xproj.reshape(T, B_pad, 4 * H)

        y, h_l, c_l = lstm_layer_pallas(xproj, w_hh_t, h0_p[layer], c0_p[layer])
        layer_in = y
        h_outs.append(h_l)
        c_outs.append(c_l)

    last = layer_in[-1]                           # output[:, -1, :]  -> (B_pad, H)
    last = last.reshape(-1, 1024)                 # .view([-1, 1024]) (needs H == 1024)
    # Tiny classifier head: plain XLA dot (Pallas launch would cost more than the math).
    result = jnp.dot(last, jnp.transpose(params["cls_w"])) + params["cls_b"]

    result = result[:B]
    h_out = jnp.stack(h_outs)[:, :B, :]
    c_out = jnp.stack(c_outs)[:, :B, :]
    return result, (h_out, c_out)


# ------------------------------ pure-JAX reference ------------------------------

def ref_forward(x, h0, c0, params):
    B, T, _ = x.shape
    num_layers = h0.shape[0]
    layer_in = x
    h_list, c_list = [], []
    for layer in range(num_layers):
        w_ih, w_hh, b_ih, b_hh = params["lstm"][layer]
        h_l, c_l = h0[layer], c0[layer]
        ys = []
        for t in range(T):
            xt = layer_in[:, t, :]
            gates = (jnp.dot(xt, w_ih.T) + b_ih + jnp.dot(h_l, w_hh.T) + b_hh)
            i, f, g, o = jnp.split(gates, 4, axis=-1)
            i, f, o = jax.nn.sigmoid(i), jax.nn.sigmoid(f), jax.nn.sigmoid(o)
            g = jnp.tanh(g)
            c_l = f * c_l + i * g
            h_l = o * jnp.tanh(c_l)
            ys.append(h_l)
        layer_in = jnp.stack(ys, axis=1)
        h_list.append(h_l)
        c_list.append(c_l)
    out = layer_in[:, -1, :].reshape(-1, 1024)
    result = jnp.dot(out, params["cls_w"].T) + params["cls_b"]
    return result, (jnp.stack(h_list), jnp.stack(c_list))


# ------------------------------------ main ------------------------------------

if __name__ == "__main__":
    # hidden_size is forced to 1024 by the .view([-1, 1024]) in the reference model.
    input_size, hidden_size, output_size, num_layers = 32, 1024, 16, 2
    B, T = 2, 8

    key = jax.random.PRNGKey(0)
    key, kx, kh, kc, kp = jax.random.split(key, 5)
    x = jax.random.normal(kx, (B, T, input_size), jnp.float32)
    h0 = 0.1 * jax.random.normal(kh, (num_layers, B, hidden_size), jnp.float32)
    c0 = 0.1 * jax.random.normal(kc, (num_layers, B, hidden_size), jnp.float32)
    params = init_params(kp, input_size, hidden_size, output_size, num_layers)

    result, (h_out, c_out) = my_lstm_forward(x, h0, c0, params, hidden_size)
    jax.block_until_ready((result, h_out, c_out))

    assert result.shape == (B, output_size)
    assert h_out.shape == (num_layers, B, hidden_size)
    assert c_out.shape == (num_layers, B, hidden_size)

    r_ref, (h_ref, c_ref) = ref_forward(x, h0, c0, params)
    assert jnp.allclose(result, r_ref, atol=1e-2, rtol=1e-2)
    assert jnp.allclose(h_out, h_ref, atol=1e-2, rtol=1e-2)
    assert jnp.allclose(c_out, c_ref, atol=1e-2, rtol=1e-2)

    print("KERNEL_OK")
</pallas_src>

<mosaic_0001>
module attributes {stable_mosaic.version = 11 : i64} {
  func.func @_linear_kernel(%arg0: i32, %arg1: memref<64x32xf32, #tpu.memory_space<vmem>>, %arg2: memref<32x512xbf16, #tpu.memory_space<vmem>>, %arg3: memref<1x512xf32, #tpu.memory_space<vmem>>, %arg4: memref<64x512xf32, #tpu.memory_space<vmem>>) attributes {dimension_semantics = [#tpu.dimension_semantics<parallel>], iteration_bounds = array<i64: 8>, scalar_prefetch = 0 : i64, scratch_operands = 0 : i64, tpu.core_type = #tpu.core_type<tc>, window_params = [{pipeline_mode = #tpu.pipeline_mode<synchronous>, transform_indices = @transform_0, window_bounds = array<i64: 64, 32>}, {transform_indices = @transform_1, window_bounds = array<i64: 32, 512>}, {transform_indices = @transform_2, window_bounds = array<i64: 1, 512>}, {transform_indices = @transform_3, window_bounds = array<i64: 64, 512>}]} {
    %c0 = arith.constant 0 : index
    %c0_0 = arith.constant 0 : index
    %0 = vector.load %arg1[%c0, %c0_0] : memref<64x32xf32, #tpu.memory_space<vmem>>, vector<64x32xf32>
    %1 = arith.truncf %0 : vector<64x32xf32> to vector<64x32xbf16>
    %c0_1 = arith.constant 0 : index
    %c0_2 = arith.constant 0 : index
    %2 = vector.load %arg2[%c0_1, %c0_2] : memref<32x512xbf16, #tpu.memory_space<vmem>>, vector<32x512xbf16>
    %cst = arith.constant dense<0.000000e+00> : vector<64x512xf32>
    %3 = tpu.matmul %1, %2, %cst {dimension_numbers = #tpu.dot_dimension_numbers<[1], [0], [0], [1], [0, 0, 1, 1], [], []>} : vector<64x32xbf16>, vector<32x512xbf16>, vector<64x512xf32> -> vector<64x512xf32>
    %c0_3 = arith.constant 0 : index
    %c0_4 = arith.constant 0 : index
    %4 = vector.load %arg3[%c0_3, %c0_4] : memref<1x512xf32, #tpu.memory_space<vmem>>, vector<1x512xf32>
    %5 = vector.broadcast %4 : vector<1x512xf32> to vector<64x512xf32>
    %6 = arith.addf %3, %5 : vector<64x512xf32>
    %c0_5 = arith.constant 0 : index
    %c0_6 = arith.constant 0 : index
    %7 = vector.load %arg4[%c0_5, %c0_6] : memref<64x512xf32, #tpu.memory_space<vmem>>, vector<64x512xf32>
    tpu.vector_store %arg4[%c0_5, %c0_6], %6 {strides = array<i32>} : memref<64x512xf32, #tpu.memory_space<vmem>>, vector<64x512xf32>,
    return
  }
  func.func @transform_0(%arg0: i32) -> (i32, i32) {
    %c0_i32 = arith.constant 0 : i32
    %c0_i32_0 = arith.constant 0 : i32
    %c0_i32_1 = arith.constant 0 : i32
    return %c0_i32, %c0_i32_0 : i32, i32
  }
  func.func @transform_1(%arg0: i32) -> (i32, i32) {
    %c0_i32 = arith.constant 0 : i32
    %c0_i32_0 = arith.constant 0 : i32
    return %c0_i32, %arg0 : i32, i32
  }
  func.func @transform_2(%arg0: i32) -> (i32, i32) {
    %c0_i32 = arith.constant 0 : i32
    %c0_i32_0 = arith.constant 0 : i32
    return %c0_i32, %arg0 : i32, i32
  }
  func.func @transform_3(%arg0: i32) -> (i32, i32) {
    %c0_i32 = arith.constant 0 : i32
    %c0_i32_0 = arith.constant 0 : i32
    return %c0_i32, %arg0 : i32, i32
  }
}

</mosaic_0001>

<bundles_post_ra>
// kernel: tpu_custom_call.1
= control target key start
LH: loop header
LB: loop body
LE: loop exit
PB: predicated region body
PF: predicated region fallthrough
CT: control target
= control target key end

     0   :  { %8 = vsyncpa [#allocation3], 0  ;;  %s1079_s0 = inlined_call_operand.vmem [shape: f32[64,32], index: 0, kind: input, shape index: {}]   ;;  %s1080_s1 = inlined_call_operand.hbm [shape: bf16[32,4096], index: 1, kind: input, shape index: {}]   ;;  %s1081_s2 = inlined_call_operand.vmem [shape: f32[1,4096], index: 2, kind: input, shape index: {}]   ;;  %s1082_s3 = inlined_call_operand.hbm [shape: f32[64,4096], index: 3, kind: output, shape index: {}]  }
   0x1   :  { %10 = vsyncpa [#allocation3 + $0x1], 0 }
   0x2   :  { %11 = vsyncpa [#allocation4], 0 }
   0x3   :  { %13 = vsyncpa [#allocation4 + $0x1], 0  ;;  %s805_s12 = smov 0   ;;  %s807_s13 = smov 0  }
   0x4   :  { %s809_s14 = smov 0   ;;  %s811_s15 = smov 0  }
   0x5 LB: > { %s826_s16 = sadd.s32 4294967295, %s774_s15   ;;  %s580_s17 = sadd.s32 4294967294, %s774_s15   ;;  %s774_s15 = sphi %s811_s15, %s1095_s15   ;;  %s770_s14 = sphi %s809_s14, %s1094_s14   ;;  %s766_s13 = sphi %s807_s13, %s1093_s13   ;;  %s762_s12 = sphi %s805_s12, %s1092_s12  }
   0x6   : > { %s830_s18 = sadd.s32 1, %s774_s15   ;;  %s47_s19 = sadd.s32 1, %s770_s14 }
   0x7   : > { %s44_s20 = ssub.s32 %s774_s15, %s830_s18  ;;  %p54_p0 = scmp.ne.s32.totalorder %s770_s14, %s766_s13 }
   0x8   : > { %p45_p1 = scmp.eq.s32.totalorder %s44_s20, 0  ;;  %p55_p2 = scmp.eq.s32.totalorder %s774_s15, 0 }
   0x9   : > { %p60_p3 = scmp.ne.s32.totalorder %s766_s13, %s762_s12  ;;  %p61_p4 = scmp.eq.s32.totalorder %s826_s16, 0 }
   0xa   : > { %s842_s21 = scalar_select %p45_p1, %s770_s14, %s47_s19  }
   0xb   : > { %p844_p5 = por %p55_p2, %p54_p0  ;;  %p848_p6 = por %p61_p4, %p60_p3 }
   0xc   : > { %p110_p7 = scmp.eq.s32.totalorder %s826_s16, 7  ;;  %p116_p8 = scmp.eq.s32.totalorder %s580_s17, 7 }
   0xd   : > { %p625_p9 = scmp.lt.s32.totalorder %s774_s15, 8  ;;  %s139_s26 = sand.u32 1, %s770_s14  }
   0xe   : > { %p854_p10 = por %p110_p7, %p54_p0  ;;  %p858_p11 = por %p116_p8, %p60_p3 }
   0xf   : > { %s611_s27 = sshll.u32 %s774_s15, 8  ;;  %s583_s28 = sshll.u32 %s139_s26, 6 }
  0x10   : > { %s1086_s24 = scalar_select %p854_p10, 1, 0 }
  0x11   : > { %s1087_s25 = scalar_select %p858_p11, 1, 0 }
  0x12   : > { %s867_s4 = scalar_lea.hbm %s1080_s1, %s611_s27  ;;  %s143_s5 = scalar_lea.vmem [#allocation2], %s583_s28 }
  0x13   : > { %s150_s6 = sshll.u32 %s143_s5, 4  ;;  %p871_p12 = pnand %p625_p9, %p844_p5  ;;  %s875_s6 = int_to_ptr.vmem [resolvable:$true] %s150_s6 }
  0x14   : > { %s878_s8 = scalar_lea.sflag [#allocation3], %s139_s26  ;;  %s678_s9 = scalar_lea.hbm %s867_s4, 1024 }
  0x15   : > { %p679_p0 = scmp.ne.s32.totalorder %s867_s4, %s678_s9  ;;  %p680_p1 = pneg %p871_p12 }
  0x16   : > { %s683_s17 = scalar_lea.hbm %s1080_s1, 8192  ;;  %p684_p4 = scmp.lt.u32.totalorder %s867_s4, %s1080_s1 }
  0x17   : > { %p681_p2 = pnand %p680_p1, %p679_p0  ;;  %p685_p5 = scmp.lt.u32.totalorder %s683_s17, %s678_s9 }
  0x18   : > { %p687_p8 = scmp.lt.u32.totalorder %s678_s9, %s867_s4 }
  0x19   : > { %p682_p3 = pneg %p681_p2  ;;  %p686_p7 = por %p685_p5, %p684_p4 }
  0x1b   : > { %p688_p9 = por %p687_p8, %p686_p7 }
  0x1d   : > { %p689_p13 = pnand %p688_p9, %p682_p3 }
  0x1f   : > { %692 = shalt.err (!%p689_p13)
}
  0x20   : > { %s693_s22 = scalar_lea.vmem %s875_s6, 1024  ;;  %s776_s26 = smov [#allocation2]  }
  0x21   : > { %p694_p0 = scmp.ne.s32.totalorder %s875_s6, %s693_s22  ;;  %s698_s27 = sshll.u32 %s776_s26, 4  ;;  %s699_s27 = int_to_ptr.vmem [resolvable:$false] %s698_s27 }
  0x22   : > { %s700_s28 = scalar_lea.vmem %s699_s27, 2048  ;;  %p701_p10 = scmp.lt.s32.totalorder %s875_s6, %s699_s27 }
  0x23   : > { %p696_p2 = pnand %p694_p0, %p680_p1  ;;  %p702_p4 = scmp.lt.s32.totalorder %s700_s28, %s693_s22 }
  0x25   : > { %p697_p11 = pneg %p696_p2  ;;  %p703_p5 = por %p702_p4, %p701_p10 }
  0x27   : > { %p704_p7 = pnand %p703_p5, %p697_p11 }
  0x29   : > { %707 = shalt.err (!%p704_p7)
}
  0x2a   : > { %s777_s29 = smov 2048   ;;  %s778_s30 = smov 256  }
  0x2b   : > { %s779_s5 = smov 16   ;;  %p166_p13 = scmp.lt.s32.totalorder %s774_s15, 9 }
  0x2c   : > { %620 = dma.hbm_to_vmem [thread:$0]  (!%p871_p12), %s867_s4, 1024, %s875_s6, %s878_s8, %s777_s29, %s778_s30, %s779_s5  }
  0x2d   : > { %p1089_p1 = scmp.ge.s32.totalorder %s774_s15, 1 }
  0x2f   : > { %p167_p3 = pnand %p1089_p1, %p166_p13 }
  0x30   : > { %s910_s9 = sand.u32 (!%p167_p3), 1, %s766_s13  }
  0x31   : > { %170 = sbr.rel (%p167_p3) target bundleno = 324 (0x144), region = 32  ;;  %s587_s10 = sshll.u32 (!%p167_p3), %s910_s9, 6 }
  0x32   : > { %s173_s11 = scalar_lea.sflag (!%p167_p3), [#allocation3], %s910_s9  ;;  %s176_s17 = scalar_lea.vmem (!%p167_p3), [#allocation2], %s587_s10 }
  0x38   : > { %753 = dma.done.wait (%p848_p6), %s173_s11, 1024  }
  0x39   : > { %755 = vsyncadd (%p848_p6), %s173_s11, 4294966272  ;;  %v780_v0 = vmov 0   ;;  %v666_v1 = vld [vmem:[%s176_s17 + $0x4] ss:$16 sps:$4 sm:$0xff]   ;;  %v668_v2 = vld [vmem:[%s176_s17 + $0xc] ss:$16 sps:$4 sm:$0xff]   ;;  %v233_v21 = vlaneseq }
  0x3a   : > { %338 = vmatprep.mubr.bf16.mxu0 %v780_v0  ;;  %411 = vmatprep.mubr.bf16.mxu1 %v780_v0  ;;  %v670_v3 = vld [vmem:[%s176_s17] ss:$16 sps:$4 sm:$0xff]   ;;  %v671_v4 = vld [vmem:[%s176_s17 + $0x8] ss:$16 sps:$4 sm:$0xff]   ;;  %v672_v5 = vld [vmem:[%s176_s17 + $0x24] ss:$16 sps:$4 sm:$0xff]  }
  0x3b   : > { %306 = vmatprep.subr.bf16.mxu0 %v666_v1  ;;  %379 = vmatprep.subr.bf16.mxu1 %v668_v2  ;;  %v674_v6 = vld [vmem:[%s176_s17 + $0x2c] ss:$16 sps:$4 sm:$0xff]   ;;  %v676_v7 = vld [vmem:[%s176_s17 + $0x20] ss:$16 sps:$4 sm:$0xff]   ;;  %v677_v8 = vld [vmem:[%s176_s17 + $0x28] ss:$16 sps:$4 sm:$0xff]  }
  0x3c   : > { %307 = vmatpush1.bf16.msra.mxu0 %v670_v3  ;;  %380 = vmatpush1.bf16.msra.mxu1 %v671_v4  ;;  %v211_v9 = vld [vmem:[%s1079_s0] sm:$0xff]  ;;  %v212_v10 = vld [vmem:[%s1079_s0 + $0x8] sm:$0xff]  ;;  %vm293_vm0 = vcmask 261120   ;;  %v213_v12 = vld [vmem:[%s1079_s0 + $0x10] sm:$0xff]  ;;  %s589_s17 = sshll.u32 %s826_s16, 2  ;;  %v234_v22 = vshrl.u32 %v233_v21, 7 }
  0x3d   : > { %308 = vmatprep.subr.bf16.mxu0 %v672_v5  ;;  %381 = vmatprep.subr.bf16.mxu1 %v674_v6  ;;  %v219_v11 = vpack.c.bf16 %v212_v10, %v211_v9  ;;  %v214_v13 = vld [vmem:[%s1079_s0 + $0x18] sm:$0xff]  ;;  %v215_v15 = vld [vmem:[%s1079_s0 + $0x20] sm:$0xff]  ;;  %v216_v16 = vld [vmem:[%s1079_s0 + $0x28] sm:$0xff]  ;;  %p205_p6 = scmp.lt.s32.totalorder %s589_s17, 31  ;;  %s588_s7 = sshll.u32 %s910_s9, 8 }
  0x3e   : > { %v220_v14 = vpack.c.bf16 %v214_v13, %v213_v12  ;;  %v221_v17 = vpack.c.bf16 %v216_v16, %v215_v15  ;;  %v217_v18 = vld [vmem:[%s1079_s0 + $0x30] sm:$0xff]  ;;  %v218_v19 = vld [vmem:[%s1079_s0 + $0x38] sm:$0xff]  ;;  %v235_v23 = vsub.s32 0, %v234_v22  ;;  %v243_v24 = vsub.s32 2, %v234_v22  ;;  %s967_s8 = scalar_lea.vmem [#allocation5], %s588_s7  ;;  %s612_s19 = sshll.u32 %s826_s16, 9 }
  0x3f   : > { %v222_v20 = vpack.c.bf16 %v218_v19, %v217_v18  ;;  %s1097_s17 = smov (!%p205_p6, %s589_s17), 31  ;;  %v239_v26 = vsub.s32 1, %v234_v22  ;;  %v247_v27 = vsub.s32 3, %v234_v22  ;;  %s498_s20 = sshll.u32 %s967_s8, 4  ;;  %s1028_s20 = int_to_ptr.vmem [resolvable:$true] %s498_s20 }
  0x40   : > { %309 = vmatpush1.bf16.msra.mxu0 %v676_v7  ;;  %382 = vmatpush1.bf16.msra.mxu1 %v677_v8  ;;  %s207_s23 = scalar_lea.vmem %s1081_s2, %s1097_s17  ;;  %s1022_s26 = scalar_lea.hbm %s1082_s3, %s612_s19 }
  0x41   : > { %v231_v25 = vld [vmem:[%s207_s23] sm:$0xf]  ;;  %s485_s27 = scalar_lea.sflag [#allocation4], %s910_s9  ;;  %s708_s28 = scalar_lea.vmem %s1028_s20, 4096 }
  0x42   : > { %v955_v28 = vrot.slane %v231_v25, %v235_v23  ;;  %v957_v29 = vrot.slane %v231_v25, %v243_v24  ;;  %v959_v30 = vrot.slane %v231_v25, %v239_v26  ;;  %v961_v31 = vrot.slane %v231_v25, %v247_v27  ;;  %p709_p10 = scmp.ne.s32.totalorder %s1028_s20, %s708_s28  ;;  %p1090_p11 = scmp.ne.s32.totalorder %s1086_s24, 0 }
  0x43   : > { %598 = vmatmul.mubr.msk.bf16.vlgmr.msra.gmra.mrb[0].mxu0 %vm293_vm0, %v219_v11  ;;  %602 = vmatmul.mubr.msk.bf16.vlgmr.msra.gmra.mrb[0].mxu1 %vm293_vm0, %v219_v11  ;;  %s781_s29 = smov [#allocation5]  }
  0x44   : > { %348 = vmatprep.mubr.bf16.mxu0 %v780_v0  ;;  %421 = vmatprep.mubr.bf16.mxu1 %v780_v0  ;;  %p710_p12 = pnand %p709_p10, %p1090_p11  ;;  %s712_s30 = sshll.u32 %s781_s29, 4  ;;  %s713_s30 = int_to_ptr.vmem [resolvable:$false] %s712_s30 }
  0x45   : > { %s714_s5 = scalar_lea.vmem %s713_s30, 8192  ;;  %p715_p9 = scmp.lt.s32.totalorder %s1028_s20, %s713_s30 }
  0x46   : > { %p711_p8 = pneg %p710_p12  ;;  %p716_p0 = scmp.lt.s32.totalorder %s714_s5, %s708_s28 }
  0x48   : > { %p717_p2 = por %p716_p0, %p715_p9 }
  0x4a   : > { %p718_p4 = pnand %p717_p2, %p711_p8 }
  0x4b   : > { %599 = vmatmul.mubr.msk.bf16.gmra.mrb[4].mxu0 %vm293_vm0, %v220_v14  ;;  %603 = vmatmul.mubr.msk.bf16.gmra.mrb[4].mxu1 %vm293_vm0, %v220_v14 }
  0x4c   : > { %358 = vmatprep.mubr.bf16.mxu0 %v780_v0  ;;  %431 = vmatprep.mubr.bf16.mxu1 %v780_v0 }
  0x53   : > { %600 = vmatmul.mubr.msk.bf16.gmra.mrb[8].mxu0 %vm293_vm0, %v221_v17  ;;  %604 = vmatmul.mubr.msk.bf16.gmra.mrb[8].mxu1 %vm293_vm0, %v221_v17 }
  0x54   : > { %368 = vmatprep.mubr.bf16.mxu0 %v780_v0  ;;  %441 = vmatprep.mubr.bf16.mxu1 %v780_v0 }
  0x5b   : > { %601 = vmatmul.mubr.msk.bf16.gmra.mrb[12].mxu0 %vm293_vm0, %v222_v20  ;;  %605 = vmatmul.mubr.msk.bf16.gmra.mrb[12].mxu1 %vm293_vm0, %v222_v20 }
 0x116   : > { %v340_v32 = vpop.f32.mrb[0].mxu0  ;;  %v413_v33 = vpop.f32.mrb[0].mxu1 }
 0x117   : > { %v341_v34 = vadd.f32 %v340_v32, %v955_v28  ;;  %v414_v35 = vadd.f32 %v413_v33, %v957_v29  ;;  %v342_v36 = vpop.f32.mrb[1].mxu0  ;;  %v415_v37 = vpop.f32.mrb[1].mxu1 }
 0x118   : > { %v343_v38 = vadd.f32 %v342_v36, %v959_v30  ;;  %v416_v39 = vadd.f32 %v415_v37, %v961_v31  ;;  %v344_v40 = vpop.f32.mrb[2].mxu0  ;;  %v417_v41 = vpop.f32.mrb[2].mxu1 }
 0x119   : > { %452 = vst [vmem:[%s967_s8] sm:$0xff] %v341_v34  ;;  %454 = vst [vmem:[%s967_s8 + $0x10] sm:$0xff] %v414_v35  ;;  %v345_v42 = vadd.f32 %v344_v40, %v955_v28  ;;  %v418_v43 = vadd.f32 %v417_v41, %v957_v29  ;;  %v346_v44 = vpop.f32.mrb[3].mxu0  ;;  %v419_v45 = vpop.f32.mrb[3].mxu1 }
 0x11a   : > { %453 = vst [vmem:[%s967_s8 + $0x8] sm:$0xff] %v343_v38  ;;  %455 = vst [vmem:[%s967_s8 + $0x18] sm:$0xff] %v416_v39  ;;  %v347_v46 = vadd.f32 %v346_v44, %v959_v30  ;;  %v420_v47 = vadd.f32 %v419_v45, %v961_v31 }
 0x11b   : > { %456 = vst [vmem:[%s967_s8 + $0x20] sm:$0xff] %v345_v42  ;;  %458 = vst [vmem:[%s967_s8 + $0x30] sm:$0xff] %v418_v43 }
 0x11c   : > { %457 = vst [vmem:[%s967_s8 + $0x28] sm:$0xff] %v347_v46  ;;  %459 = vst [vmem:[%s967_s8 + $0x38] sm:$0xff] %v420_v47 }
 0x11e   : > { %v350_v48 = vpop.f32.mrb[4].mxu0  ;;  %v423_v49 = vpop.f32.mrb[4].mxu1 }
 0x11f   : > { %v351_v50 = vadd.f32 %v350_v48, %v955_v28  ;;  %v424_v51 = vadd.f32 %v423_v49, %v957_v29  ;;  %v352_v52 = vpop.f32.mrb[5].mxu0  ;;  %v425_v53 = vpop.f32.mrb[5].mxu1 }
 0x120   : > { %v353_v54 = vadd.f32 %v352_v52, %v959_v30  ;;  %v426_v55 = vadd.f32 %v425_v53, %v961_v31  ;;  %v354_v56 = vpop.f32.mrb[6].mxu0  ;;  %v427_v57 = vpop.f32.mrb[6].mxu1 }
 0x121   : > { %460 = vst [vmem:[%s967_s8 + $0x40] sm:$0xff] %v351_v50  ;;  %462 = vst [vmem:[%s967_s8 + $0x50] sm:$0xff] %v424_v51  ;;  %v355_v58 = vadd.f32 %v354_v56, %v955_v28  ;;  %v428_v59 = vadd.f32 %v427_v57, %v957_v29  ;;  %v356_v60 = vpop.f32.mrb[7].mxu0  ;;  %v429_v61 = vpop.f32.mrb[7].mxu1 }
 0x122   : > { %461 = vst [vmem:[%s967_s8 + $0x48] sm:$0xff] %v353_v54  ;;  %463 = vst [vmem:[%s967_s8 + $0x58] sm:$0xff] %v426_v55  ;;  %v357_v62 = vadd.f32 %v356_v60, %v959_v30  ;;  %v430_v63 = vadd.f32 %v429_v61, %v961_v31 }
 0x123   : > { %464 = vst [vmem:[%s967_s8 + $0x60] sm:$0xff] %v355_v58  ;;  %466 = vst [vmem:[%s967_s8 + $0x70] sm:$0xff] %v428_v59 }
 0x124   : > { %465 = vst [vmem:[%s967_s8 + $0x68] sm:$0xff] %v357_v62  ;;  %467 = vst [vmem:[%s967_s8 + $0x78] sm:$0xff] %v430_v63 }
 0x126   : > { %v360_v0 = vpop.f32.mrb[8].mxu0  ;;  %v433_v1 = vpop.f32.mrb[8].mxu1 }
 0x127   : > { %v361_v2 = vadd.f32 %v360_v0, %v955_v28  ;;  %v434_v3 = vadd.f32 %v433_v1, %v957_v29  ;;  %v362_v4 = vpop.f32.mrb[9].mxu0  ;;  %v435_v5 = vpop.f32.mrb[9].mxu1 }
 0x128   : > { %v363_v6 = vadd.f32 %v362_v4, %v959_v30  ;;  %v436_v7 = vadd.f32 %v435_v5, %v961_v31  ;;  %v364_v8 = vpop.f32.mrb[10].mxu0  ;;  %v437_v9 = vpop.f32.mrb[10].mxu1 }
 0x129   : > { %468 = vst [vmem:[%s967_s8 + $0x80] sm:$0xff] %v361_v2  ;;  %470 = vst [vmem:[%s967_s8 + $0x90] sm:$0xff] %v434_v3  ;;  %v365_v10 = vadd.f32 %v364_v8, %v955_v28  ;;  %v438_v11 = vadd.f32 %v437_v9, %v957_v29  ;;  %v366_v12 = vpop.f32.mrb[11].mxu0  ;;  %v439_v13 = vpop.f32.mrb[11].mxu1 }
 0x12a   : > { %469 = vst [vmem:[%s967_s8 + $0x88] sm:$0xff] %v363_v6  ;;  %471 = vst [vmem:[%s967_s8 + $0x98] sm:$0xff] %v436_v7  ;;  %v367_v14 = vadd.f32 %v366_v12, %v959_v30  ;;  %v440_v15 = vadd.f32 %v439_v13, %v961_v31 }
 0x12b   : > { %472 = vst [vmem:[%s967_s8 + $0xa0] sm:$0xff] %v365_v10  ;;  %474 = vst [vmem:[%s967_s8 + $0xb0] sm:$0xff] %v438_v11 }
 0x12c   : > { %473 = vst [vmem:[%s967_s8 + $0xa8] sm:$0xff] %v367_v14  ;;  %475 = vst [vmem:[%s967_s8 + $0xb8] sm:$0xff] %v440_v15 }
 0x12e   : > { %v370_v16 = vpop.f32.mrb[12].mxu0  ;;  %v443_v17 = vpop.f32.mrb[12].mxu1 }
 0x12f   : > { %v371_v18 = vadd.f32 %v370_v16, %v955_v28  ;;  %v444_v19 = vadd.f32 %v443_v17, %v957_v29  ;;  %v372_v20 = vpop.f32.mrb[13].mxu0  ;;  %v445_v21 = vpop.f32.mrb[13].mxu1 }
 0x130   : > { %v373_v22 = vadd.f32 %v372_v20, %v959_v30  ;;  %v446_v23 = vadd.f32 %v445_v21, %v961_v31  ;;  %v374_v24 = vpop.f32.mrb[14].mxu0  ;;  %v447_v25 = vpop.f32.mrb[14].mxu1 }
 0x131   : > { %476 = vst [vmem:[%s967_s8 + $0xc0] sm:$0xff] %v371_v18  ;;  %478 = vst [vmem:[%s967_s8 + $0xd0] sm:$0xff] %v444_v19  ;;  %v375_v26 = vadd.f32 %v374_v24, %v955_v28  ;;  %v448_v27 = vadd.f32 %v447_v25, %v957_v29  ;;  %v376_v32 = vpop.f32.mrb[15].mxu0  ;;  %v449_v33 = vpop.f32.mrb[15].mxu1 }
 0x132   : > { %477 = vst [vmem:[%s967_s8 + $0xc8] sm:$0xff] %v373_v22  ;;  %479 = vst [vmem:[%s967_s8 + $0xd8] sm:$0xff] %v446_v23  ;;  %v377_v34 = vadd.f32 %v376_v32, %v959_v30  ;;  %v450_v35 = vadd.f32 %v449_v33, %v961_v31 }
 0x133   : > { %480 = vst [vmem:[%s967_s8 + $0xe0] sm:$0xff] %v375_v26  ;;  %482 = vst [vmem:[%s967_s8 + $0xf0] sm:$0xff] %v448_v27 }
 0x134   : > { %481 = vst [vmem:[%s967_s8 + $0xe8] sm:$0xff] %v377_v34  ;;  %483 = vst [vmem:[%s967_s8 + $0xf8] sm:$0xff] %v450_v35 }
 0x135   : > { %721 = shalt.err (!%p718_p4)
}
 0x136   : > { %s722_s10 = scalar_lea.hbm %s1022_s26, 4096  ;;  %s726_s4 = scalar_lea.hbm %s1082_s3, 32768 }
 0x137   : > { %p723_p5 = scmp.ne.s32.totalorder %s1022_s26, %s722_s10  ;;  %p727_p1 = scmp.lt.u32.totalorder %s1022_s26, %s1082_s3 }
 0x138   : > { %p728_p3 = scmp.lt.u32.totalorder %s726_s4, %s722_s10  ;;  %p730_p10 = scmp.lt.u32.totalorder %s722_s10, %s1022_s26 }
 0x139   : > { %p724_p7 = pnand %p723_p5, %p1090_p11 }
 0x13a   : > { %p729_p6 = por %p728_p3, %p727_p1 }
 0x13b   : > { %p725_p13 = pneg %p724_p7 }
 0x13c   : > { %p731_p12 = por %p730_p10, %p729_p6 }
 0x13e   : > { %p732_p8 = pnand %p731_p12, %p725_p13 }
 0x140   : > { %735 = shalt.err (!%p732_p8)
}
 0x141   : > { %s782_s7 = smov 512   ;;  %s783_s8 = smov 4096  }
 0x142   : > { %s784_s19 = smov 32  }
 0x143   : > { %615 = dma.vmem_to_hbm [thread:$0]  (%p1090_p11), %s1028_s20, 4096, %s1022_s26, %s485_s27, %s782_s7, %s783_s8, %s784_s19  }
 0x144 PF: > { %p626_p9 = scmp.ge.s32.totalorder %s774_s15, 2  ;;  %s513_s16 = sand.u32 1, %s762_s12  }
 0x145   : > { %p1091_p0 = scmp.ne.s32.totalorder %s1087_s25, 0  ;;  %s514_s22 = scalar_lea.sflag [#allocation4], %s513_s16 }
 0x147   : > { %p622_p2 = pnand %p626_p9, %p1091_p0 }
 0x149   : > { %757 = dma.done.wait (!%p622_p2), %s514_s22, 4096  }
 0x14a   : > { %759 = vsyncadd (!%p622_p2), %s514_s22, 4294963200  ;;  %p16_p4 = scmp.ge.s32.totalorder %s830_s18, 10   ;;  %s1092_s12 = smov %s766_s13 }
 0x14b   : > { %s1093_s13 = smov %s770_s14  ;;  %s1094_s14 = smov %s842_s21 }
 0x14c   : > { %s1095_s15 = smov %s830_s18  ;;  %18 = sbr.rel (!%p16_p4) target bundleno = 5 (0x5), region = 80 }
 0x153   :  { %519 = vsyncpa [#allocation3], 1 }
 0x154   :  { %521 = vsyncpa [#allocation3 + $0x1], 1 }
 0x155   :  { %522 = vsyncpa [#allocation4], 1 }
 0x156   :  { %524 = vsyncpa [#allocation4 + $0x1], 1 }

</bundles_post_ra>
